<compile_context>
chip_gen: v5e
topology: v5e:2x2
jax: 0.10.0
libtpu: 0.0.40
codegen_flags: <defaults>
</compile_context>

<pallas_src>
import jax
import jax.numpy as jnp
from jax.experimental import pallas as pl
from jax.experimental.pallas import tpu as pltpu

LN_EPS = 1e-5


def _patch_merging_kernel(x_ref, wgt_ref, wsum_ref, bias_ref, o_ref):
    # x_ref   : (1, 4C, TM)  stacked merged-patch features, order (h_off, w_off, c)
    # wgt_ref : (2C, 4C)     (W * gamma)^T in the MXU dtype
    # wsum_ref: (2C, 1)      column sums of W*gamma (f32)
    # bias_ref: (2C, 1)      b + beta @ W (f32)
    # o_ref   : (1, 2C, TM)  output slab (NCHW layout, tokens on lanes)
    c4 = x_ref.shape[1]
    c = c4 // 4
    inv_4c = 1.0 / c4

    # Single MXU matmul on RAW x (LayerNorm affine already folded into
    # wgt / wsum / bias); f32 accumulation.
    acc = jnp.dot(wgt_ref[...], x_ref[0].astype(wgt_ref.dtype),
                  preferred_element_type=jnp.float32)              # (2C, TM)

    # Two-pass LayerNorm statistics over all 4C features (f32; eps placement
    # matches nn.LayerNorm).  Chunked re-reads of the VMEM ref keep at most one
    # (C, TM) f32 temporary live at a time.
    s = jnp.sum(x_ref[0, 0:c, :].astype(jnp.float32), axis=0, keepdims=True)
    for k in range(1, 4):
        s = s + jnp.sum(x_ref[0, k * c:(k + 1) * c, :].astype(jnp.float32),
                        axis=0, keepdims=True)
    mean = s * inv_4c                                              # (1, TM)

    d0 = x_ref[0, 0:c, :].astype(jnp.float32) - mean
    v = jnp.sum(d0 * d0, axis=0, keepdims=True)
    for k in range(1, 4):
        d = x_ref[0, k * c:(k + 1) * c, :].astype(jnp.float32) - mean
        v = v + jnp.sum(d * d, axis=0, keepdims=True)
    inv_std = jax.lax.rsqrt(v * inv_4c + LN_EPS)                   # (1, TM)

    # Epilogue: per-lane scale + per-sublane bias on the (2C, TM) accumulator.
    out = (acc - mean * wsum_ref[...]) * inv_std + bias_ref[...]
    o_ref[0] = out.astype(o_ref.dtype)


def _round_up(x, m):
    return (x + m - 1) // m * m


def _cdiv(a, b):
    return (a + b - 1) // b


def _pick_tile_and_vmem(B, L, c4, c2, x_isize, w_isize, out_isize):
    """Pick the token tile TM and a right-sized explicit VMEM limit."""
    try:
        cap = int(pltpu.get_tpu_info().vmem_capacity_bytes)
    except Exception:
        cap = 64 * 1024 * 1024              # conservative (v7x-sized) fallback
    budget = int(min(cap, 128 * 1024 * 1024) * 0.6)

    # Constant-index operands (assume the compiler may double-buffer them).
    w_bytes = 2 * _round_up(c2, 8) * _round_up(c4, 128) * w_isize
    param_bytes = 2 * 2 * _round_up(c2, 8) * 128 * 4       # wsum + bias (f32)

    def tiles_bytes(tm):
        tm_p = _round_up(tm, 128)
        in_b = 2 * _round_up(c4, 8) * tm_p * x_isize        # double-buffered
        out_b = 2 * _round_up(c2, 8) * tm_p * out_isize
        return in_b + out_b

    tm = None
    for cand in (2048, 1024, 512, 256, 128):
        if cand <= L and w_bytes + param_bytes + tiles_bytes(cand) <= budget:
            tm = cand
            break
    if tm is None:
        # TODO(synk): for L < 128 pack batch rows onto the lane axis so stores
        # stay unmasked; at these sizes the layer is tiny anyway.
        tm = L if L < 128 else 128

    # v7x has 2 TensorCores: keep both busy on deep (small-L) stages as long as
    # shrinking TM actually adds grid steps.  Costs at most a couple of
    # ~0.35us extra steps on single-core chips.
    while tm > 128 and B * _cdiv(L, tm) < 4 and _cdiv(L, tm // 2) > _cdiv(L, tm):
        tm //= 2

    need = w_bytes + param_bytes + tiles_bytes(tm)
    vmem_limit = int(min(cap, max(need + (8 << 20), 24 << 20)))
    return tm, vmem_limit


def patch_merging(x, gamma, beta, w, b):
    """PatchMerging forward: x (B, C, H, W) -> (B, 2C, H//2, W//2).

    gamma/beta: (4C,) LayerNorm affine (feature order h_off, w_off, c),
    w: (4C, 2C) reduction weight (input-major, i.e. nn.Linear weight.T),
    b: (2C,).  Pass bf16 `w` for the fast MXU path (esp. on v5e); LN math and
    the epilogue stay in f32 either way.
    """
    B, C, H, W = x.shape
    newH, newW = H // 2, W // 2
    L = newH * newW
    C4 = 4 * C
    C2 = w.shape[1]
    out_dtype = x.dtype

    # One fused gather: (B, C, H, W) -> (B, 4C, L), feature order (h_off,
    # w_off, c) matching the reference permute.
    # TODO(synk): feed raw x and de-interleave in-kernel to halve HBM traffic.
    xr = x.reshape(B, C, newH, 2, newW, 2)
    xs = jnp.transpose(xr, (0, 3, 5, 1, 2, 4)).reshape(B, C4, L)

    # Fold the LayerNorm affine into the reduction weight / bias (f32 math,
    # then cast the matmul weight back to its original dtype).
    w_f32 = w.astype(jnp.float32)
    gamma_f32 = gamma.astype(jnp.float32)
    beta_f32 = beta.astype(jnp.float32)
    wg = w_f32 * gamma_f32[:, None]                          # (4C, 2C)
    wgt = jnp.transpose(wg).astype(w.dtype)                  # (2C, 4C)
    wsum = jnp.sum(wg, axis=0).reshape(C2, 1)                # (2C, 1) f32
    bias2 = (b.astype(jnp.float32) + beta_f32 @ w_f32).reshape(C2, 1)

    tm, vmem_limit = _pick_tile_and_vmem(
        B, L, C4, C2, x.dtype.itemsize, w.dtype.itemsize,
        jnp.dtype(out_dtype).itemsize)

    grid = (B, _cdiv(L, tm))
    const2 = lambda bi, ti: (0, 0)

    out = pl.pallas_call(
        _patch_merging_kernel,
        out_shape=jax.ShapeDtypeStruct((B, C2, L), out_dtype),
        grid=grid,
        in_specs=[
            pl.BlockSpec((1, C4, tm), lambda bi, ti: (bi, 0, ti)),
            # Constant index_maps -> resident in VMEM across grid steps.
            pl.BlockSpec((C2, C4), const2),   # (W*gamma)^T
            pl.BlockSpec((C2, 1), const2),    # column sums of W*gamma
            pl.BlockSpec((C2, 1), const2),    # folded bias
        ],
        out_specs=pl.BlockSpec((1, C2, tm), lambda bi, ti: (bi, 0, ti)),
        compiler_params=pltpu.CompilerParams(
            dimension_semantics=("parallel", "parallel"),
            vmem_limit_bytes=vmem_limit),
    )(xs, wgt, wsum, bias2)

    # Free reshape back to NCHW (same memory layout).
    return out.reshape(B, C2, newH, newW)


def _reference(x, gamma, beta, w, b):
    """Pure-JAX reference matching the PyTorch PatchMerging.forward exactly."""
    B, C, H, W = x.shape
    newH, newW = H // 2, W // 2
    xr = x.reshape(B, C, newH, 2, newW, 2)
    xr = jnp.transpose(xr, (0, 2, 4, 3, 5, 1)).reshape(B, newH * newW, 4 * C)
    mean = jnp.mean(xr, axis=-1, keepdims=True)
    var = jnp.mean((xr - mean) ** 2, axis=-1, keepdims=True)
    xn = (xr - mean) / jnp.sqrt(var + LN_EPS) * gamma + beta
    y = xn @ w + b
    y = y.reshape(B, newH, newW, 2 * C)
    return jnp.transpose(y, (0, 3, 1, 2))


if __name__ == "__main__":
    key = jax.random.PRNGKey(0)
    B, C, H, W = 2, 4, 16, 16          # dim = C = 4  ->  4*dim = 16, 2*dim = 8
    k_x, k_w, k_b, k_g, k_be = jax.random.split(key, 5)

    x = jax.random.normal(k_x, (B, C, H, W), dtype=jnp.float32)

    # Deterministic parameters; shapes match nn.LayerNorm(4C) and nn.Linear(4C, 2C)
    # (Linear weight stored transposed as (4C, 2C)).
    gamma = 1.0 + 0.05 * jax.random.normal(k_g, (4 * C,), dtype=jnp.float32)
    beta = 0.05 * jax.random.normal(k_be, (4 * C,), dtype=jnp.float32)
    w = jax.random.normal(k_w, (4 * C, 2 * C), dtype=jnp.float32) * (1.0 / (4 * C) ** 0.5)
    b = 0.01 * jax.random.normal(k_b, (2 * C,), dtype=jnp.float32)

    fn = jax.jit(patch_merging)
    out = jax.block_until_ready(fn(x, gamma, beta, w, b))
    ref = jax.block_until_ready(_reference(x, gamma, beta, w, b))

    assert out.shape == (B, 2 * C, H // 2, W // 2), out.shape
    assert jnp.allclose(out, ref, atol=2e-4, rtol=2e-4), "mismatch vs reference"

    print("KERNEL_OK")
</pallas_src>

<mosaic_0001>
module attributes {stable_mosaic.version = 11 : i64} {
  func.func @_patch_merging_kernel(%arg0: i32, %arg1: i32, %arg2: memref<1x16x64xf32, #tpu.memory_space<vmem>>, %arg3: memref<8x16xf32, #tpu.memory_space<vmem>>, %arg4: memref<8x1xf32, #tpu.memory_space<vmem>>, %arg5: memref<8x1xf32, #tpu.memory_space<vmem>>, %arg6: memref<1x8x64xf32, #tpu.memory_space<vmem>>) attributes {dimension_semantics = [#tpu.dimension_semantics<parallel>, #tpu.dimension_semantics<parallel>], iteration_bounds = array<i64: 2, 1>, scalar_prefetch = 0 : i64, scratch_operands = 0 : i64, tpu.core_type = #tpu.core_type<tc>, window_params = [{transform_indices = @transform_0, window_bounds = array<i64: 1, 16, 64>}, {pipeline_mode = #tpu.pipeline_mode<synchronous>, transform_indices = @transform_1, window_bounds = array<i64: 8, 16>}, {pipeline_mode = #tpu.pipeline_mode<synchronous>, transform_indices = @transform_2, window_bounds = array<i64: 8, 1>}, {pipeline_mode = #tpu.pipeline_mode<synchronous>, transform_indices = @transform_3, window_bounds = array<i64: 8, 1>}, {transform_indices = @transform_4, window_bounds = array<i64: 1, 8, 64>}]} {
    %c0 = arith.constant 0 : index
    %c0_0 = arith.constant 0 : index
    %0 = vector.load %arg3[%c0, %c0_0] : memref<8x16xf32, #tpu.memory_space<vmem>>, vector<8x16xf32>
    %c0_1 = arith.constant 0 : index
    %c0_2 = arith.constant 0 : index
    %c0_3 = arith.constant 0 : index
    %1 = vector.load %arg2[%c0_1, %c0_2, %c0_3] : memref<1x16x64xf32, #tpu.memory_space<vmem>>, vector<1x16x64xf32>
    %2 = vector.shape_cast %1 : vector<1x16x64xf32> to vector<16x64xf32>
    %cst = arith.constant dense<0.000000e+00> : vector<8x64xf32>
    %3 = tpu.matmul %0, %2, %cst {dimension_numbers = #tpu.dot_dimension_numbers<[1], [0], [0], [1], [0, 0, 1, 1], [], []>} : vector<8x16xf32>, vector<16x64xf32>, vector<8x64xf32> -> vector<8x64xf32>
    %c0_4 = arith.constant 0 : index
    %c0_5 = arith.constant 0 : index
    %c0_6 = arith.constant 0 : index
    %4 = vector.load %arg2[%c0_4, %c0_5, %c0_6] : memref<1x16x64xf32, #tpu.memory_space<vmem>>, vector<1x4x64xf32>
    %5 = vector.shape_cast %4 : vector<1x4x64xf32> to vector<4x64xf32>
    %cst_7 = arith.constant dense<0.000000e+00> : vector<64xf32>
    %6 = vector.multi_reduction <add>, %5, %cst_7 [0] : vector<4x64xf32> to vector<64xf32>
    %7 = vector.shape_cast %6 : vector<64xf32> to vector<1x64xf32>
    %c0_8 = arith.constant 0 : index
    %c4 = arith.constant 4 : index
    %c0_9 = arith.constant 0 : index
    %8 = vector.load %arg2[%c0_8, %c4, %c0_9] : memref<1x16x64xf32, #tpu.memory_space<vmem>>, vector<1x4x64xf32>
    %9 = vector.shape_cast %8 : vector<1x4x64xf32> to vector<4x64xf32>
    %cst_10 = arith.constant dense<0.000000e+00> : vector<64xf32>
    %10 = vector.multi_reduction <add>, %9, %cst_10 [0] : vector<4x64xf32> to vector<64xf32>
    %11 = vector.shape_cast %10 : vector<64xf32> to vector<1x64xf32>
    %12 = arith.addf %7, %11 : vector<1x64xf32>
    %c0_11 = arith.constant 0 : index
    %c8 = arith.constant 8 : index
    %c0_12 = arith.constant 0 : index
    %13 = vector.load %arg2[%c0_11, %c8, %c0_12] : memref<1x16x64xf32, #tpu.memory_space<vmem>>, vector<1x4x64xf32>
    %14 = vector.shape_cast %13 : vector<1x4x64xf32> to vector<4x64xf32>
    %cst_13 = arith.constant dense<0.000000e+00> : vector<64xf32>
    %15 = vector.multi_reduction <add>, %14, %cst_13 [0] : vector<4x64xf32> to vector<64xf32>
    %16 = vector.shape_cast %15 : vector<64xf32> to vector<1x64xf32>
    %17 = arith.addf %12, %16 : vector<1x64xf32>
    %c0_14 = arith.constant 0 : index
    %c12 = arith.constant 12 : index
    %c0_15 = arith.constant 0 : index
    %18 = vector.load %arg2[%c0_14, %c12, %c0_15] : memref<1x16x64xf32, #tpu.memory_space<vmem>>, vector<1x4x64xf32>
    %19 = vector.shape_cast %18 : vector<1x4x64xf32> to vector<4x64xf32>
    %cst_16 = arith.constant dense<0.000000e+00> : vector<64xf32>
    %20 = vector.multi_reduction <add>, %19, %cst_16 [0] : vector<4x64xf32> to vector<64xf32>
    %21 = vector.shape_cast %20 : vector<64xf32> to vector<1x64xf32>
    %22 = arith.addf %17, %21 : vector<1x64xf32>
    %cst_17 = arith.constant 6.250000e-02 : f32
    %23 = vector.broadcast %cst_17 : f32 to vector<1x64xf32>
    %24 = arith.mulf %22, %23 : vector<1x64xf32>
    %c0_18 = arith.constant 0 : index
    %c0_19 = arith.constant 0 : index
    %c0_20 = arith.constant 0 : index
    %25 = vector.load %arg2[%c0_18, %c0_19, %c0_20] : memref<1x16x64xf32, #tpu.memory_space<vmem>>, vector<1x4x64xf32>
    %26 = vector.shape_cast %25 : vector<1x4x64xf32> to vector<4x64xf32>
    %27 = vector.broadcast %24 : vector<1x64xf32> to vector<4x64xf32>
    %28 = arith.subf %26, %27 : vector<4x64xf32>
    %29 = arith.mulf %28, %28 : vector<4x64xf32>
    %cst_21 = arith.constant dense<0.000000e+00> : vector<64xf32>
    %30 = vector.multi_reduction <add>, %29, %cst_21 [0] : vector<4x64xf32> to vector<64xf32>
    %31 = vector.shape_cast %30 : vector<64xf32> to vector<1x64xf32>
    %c0_22 = arith.constant 0 : index
    %c4_23 = arith.constant 4 : index
    %c0_24 = arith.constant 0 : index
    %32 = vector.load %arg2[%c0_22, %c4_23, %c0_24] : memref<1x16x64xf32, #tpu.memory_space<vmem>>, vector<1x4x64xf32>
    %33 = vector.shape_cast %32 : vector<1x4x64xf32> to vector<4x64xf32>
    %34 = vector.broadcast %24 : vector<1x64xf32> to vector<4x64xf32>
    %35 = arith.subf %33, %34 : vector<4x64xf32>
    %36 = arith.mulf %35, %35 : vector<4x64xf32>
    %cst_25 = arith.constant dense<0.000000e+00> : vector<64xf32>
    %37 = vector.multi_reduction <add>, %36, %cst_25 [0] : vector<4x64xf32> to vector<64xf32>
    %38 = vector.shape_cast %37 : vector<64xf32> to vector<1x64xf32>
    %39 = arith.addf %31, %38 : vector<1x64xf32>
    %c0_26 = arith.constant 0 : index
    %c8_27 = arith.constant 8 : index
    %c0_28 = arith.constant 0 : index
    %40 = vector.load %arg2[%c0_26, %c8_27, %c0_28] : memref<1x16x64xf32, #tpu.memory_space<vmem>>, vector<1x4x64xf32>
    %41 = vector.shape_cast %40 : vector<1x4x64xf32> to vector<4x64xf32>
    %42 = vector.broadcast %24 : vector<1x64xf32> to vector<4x64xf32>
    %43 = arith.subf %41, %42 : vector<4x64xf32>
    %44 = arith.mulf %43, %43 : vector<4x64xf32>
    %cst_29 = arith.constant dense<0.000000e+00> : vector<64xf32>
    %45 = vector.multi_reduction <add>, %44, %cst_29 [0] : vector<4x64xf32> to vector<64xf32>
    %46 = vector.shape_cast %45 : vector<64xf32> to vector<1x64xf32>
    %47 = arith.addf %39, %46 : vector<1x64xf32>
    %c0_30 = arith.constant 0 : index
    %c12_31 = arith.constant 12 : index
    %c0_32 = arith.constant 0 : index
    %48 = vector.load %arg2[%c0_30, %c12_31, %c0_32] : memref<1x16x64xf32, #tpu.memory_space<vmem>>, vector<1x4x64xf32>
    %49 = vector.shape_cast %48 : vector<1x4x64xf32> to vector<4x64xf32>
    %50 = vector.broadcast %24 : vector<1x64xf32> to vector<4x64xf32>
    %51 = arith.subf %49, %50 : vector<4x64xf32>
    %52 = arith.mulf %51, %51 : vector<4x64xf32>
    %cst_33 = arith.constant dense<0.000000e+00> : vector<64xf32>
    %53 = vector.multi_reduction <add>, %52, %cst_33 [0] : vector<4x64xf32> to vector<64xf32>
    %54 = vector.shape_cast %53 : vector<64xf32> to vector<1x64xf32>
    %55 = arith.addf %47, %54 : vector<1x64xf32>
    %cst_34 = arith.constant 6.250000e-02 : f32
    %56 = vector.broadcast %cst_34 : f32 to vector<1x64xf32>
    %57 = arith.mulf %55, %56 : vector<1x64xf32>
    %cst_35 = arith.constant 9.99999974E-6 : f32
    %58 = vector.broadcast %cst_35 : f32 to vector<1x64xf32>
    %59 = arith.addf %57, %58 : vector<1x64xf32>
    %60 = math.rsqrt %59 : vector<1x64xf32>
    %c0_36 = arith.constant 0 : index
    %c0_37 = arith.constant 0 : index
    %61 = vector.load %arg4[%c0_36, %c0_37] : memref<8x1xf32, #tpu.memory_space<vmem>>, vector<8x1xf32>
    %62 = vector.broadcast %24 : vector<1x64xf32> to vector<8x64xf32>
    %63 = vector.broadcast %61 : vector<8x1xf32> to vector<8x64xf32>
    %64 = arith.mulf %62, %63 : vector<8x64xf32>
    %65 = arith.subf %3, %64 : vector<8x64xf32>
    %66 = vector.broadcast %60 : vector<1x64xf32> to vector<8x64xf32>
    %67 = arith.mulf %65, %66 : vector<8x64xf32>
    %c0_38 = arith.constant 0 : index
    %c0_39 = arith.constant 0 : index
    %68 = vector.load %arg5[%c0_38, %c0_39] : memref<8x1xf32, #tpu.memory_space<vmem>>, vector<8x1xf32>
    %69 = vector.broadcast %68 : vector<8x1xf32> to vector<8x64xf32>
    %70 = arith.addf %67, %69 : vector<8x64xf32>
    %c0_40 = arith.constant 0 : index
    %c0_41 = arith.constant 0 : index
    %c0_42 = arith.constant 0 : index
    %71 = vector.load %arg6[%c0_40, %c0_41, %c0_42] : memref<1x8x64xf32, #tpu.memory_space<vmem>>, vector<1x8x64xf32>
    %72 = vector.shape_cast %71 : vector<1x8x64xf32> to vector<8x64xf32>
    %73 = vector.shape_cast %70 : vector<8x64xf32> to vector<1x8x64xf32>
    tpu.vector_store %arg6[%c0_40, %c0_41, %c0_42], %73 {strides = array<i32>} : memref<1x8x64xf32, #tpu.memory_space<vmem>>, vector<1x8x64xf32>,
    return
  }
  func.func @transform_0(%arg0: i32, %arg1: i32) -> (i32, i32, i32) {
    %c0_i32 = arith.constant 0 : i32
    %c0_i32_0 = arith.constant 0 : i32
    return %arg0, %c0_i32, %arg1 : i32, i32, i32
  }
  func.func @transform_1(%arg0: i32, %arg1: i32) -> (i32, i32) {
    %c0_i32 = arith.constant 0 : i32
    %c0_i32_0 = arith.constant 0 : i32
    %c0_i32_1 = arith.constant 0 : i32
    return %c0_i32, %c0_i32_0 : i32, i32
  }
  func.func @transform_2(%arg0: i32, %arg1: i32) -> (i32, i32) {
    %c0_i32 = arith.constant 0 : i32
    %c0_i32_0 = arith.constant 0 : i32
    %c0_i32_1 = arith.constant 0 : i32
    return %c0_i32, %c0_i32_0 : i32, i32
  }
  func.func @transform_3(%arg0: i32, %arg1: i32) -> (i32, i32) {
    %c0_i32 = arith.constant 0 : i32
    %c0_i32_0 = arith.constant 0 : i32
    %c0_i32_1 = arith.constant 0 : i32
    return %c0_i32, %c0_i32_0 : i32, i32
  }
  func.func @transform_4(%arg0: i32, %arg1: i32) -> (i32, i32, i32) {
    %c0_i32 = arith.constant 0 : i32
    %c0_i32_0 = arith.constant 0 : i32
    return %arg0, %c0_i32, %arg1 : i32, i32, i32
  }
}

</mosaic_0001>

<bundles_post_ra>
// kernel: patch_merging.1
= control target key start
LH: loop header
LB: loop body
LE: loop exit
PB: predicated region body
PF: predicated region fallthrough
CT: control target
= control target key end

     0   :  { %s527_s15 = smov 0   ;;  %s529_s16 = smov 0   ;;  %s581_s0 = inlined_call_operand.vmem [shape: f32[2,16,64], index: 0, kind: input, shape index: {}]   ;;  %s582_s1 = inlined_call_operand.vmem [shape: f32[8,16], index: 1, kind: input, shape index: {}]   ;;  %s583_s2 = inlined_call_operand.vmem [shape: f32[8,1], index: 2, kind: input, shape index: {}]   ;;  %s584_s3 = inlined_call_operand.vmem [shape: f32[8,1], index: 3, kind: input, shape index: {}]   ;;  %s585_s4 = inlined_call_operand.vmem [shape: f32[2,8,64], index: 4, kind: output, shape index: {}]  }
   0x1   :  { %s531_s17 = smov 0  }
   0x2 LB: > { %s26_s18 = sadd.s32 1, %s495_s16  ;;  %p441_p0 = scmp.ge.s32.totalorder %s499_s17, 1  ;;  %s499_s17 = sphi %s531_s17, %s14_s17   ;;  %s495_s16 = sphi %s529_s16, %s587_s16   ;;  %s491_s15 = sphi %s527_s15, %s586_s15  }
   0x3   : > { %p28_p1 = scmp.ge.s32.totalorder %s26_s18, 2  ;;  %p181_p2 = scmp.lt.s32.totalorder %s499_s17, 3 }
   0x5   : > { %s589_s18 = smov (%p28_p1, %s26_s18), 0  ;;  %p182_p3 = pnand %p441_p0, %p181_p2 }
   0x6   : > { %p212_p4 = scmp.lt.s32.totalorder (!%p182_p3), %s491_s15, 1 }
   0x7   : > { %185 = sbr.rel (%p182_p3) target bundleno = 152 (0x98), region = 36 }
   0xc   : > { %v342_v0 = vld [vmem:[%s583_s2] sm:$0xff]  ;;  %v501_v1 = vmov 0   ;;  %s591_s15 = smov (!%p212_p4, %s491_s15), 1  ;;  %vm230_vm0 = vcmask 130048   ;;  %vm255_vm1 = vcmask 519168   ;;  %vm358_vm5 = vcmask 523264  }
   0xd   : > { %474 = vset.pattern.permute.xlu0 %v501_v1  ;;  %s448_s21 = sshll.u32 %s591_s15, 4  ;;  %v227_v3 = vld [vmem:[%s582_s1] sm:$0xff]  ;;  %s444_s29 = sshll.u32 %s591_s15, 3 }
   0xe   : > { %345 = vperm.xlu0 %474, %v342_v0   ;;  %s219_s24 = scalar_lea.vmem %s581_s0, %s448_s21  ;;  %v351_v4 = vld [vmem:[%s584_s3] sm:$0xff]  ;;  %s226_s6 = scalar_lea.vmem %s585_s4, %s444_s29 }
   0xf   : > { %v229_v2 = vld [vmem:[%s219_s24 + $0x8] sm:$0xff]  ;;  %v228_v5 = vld [vmem:[%s219_s24] sm:$0xff] }
  0x10   : > { %248 = vmatpush.msra.mxu0 %v229_v2  ;;  %v254_v6 = vld [vmem:[%s219_s24] sm:$0xf]  ;;  %v263_v7 = vld [vmem:[%s219_s24 + $0x4] sm:$0xf]  ;;  %v272_v10 = vld [vmem:[%s219_s24 + $0x8] sm:$0xf] }
  0x11   : > { %v256_v8 = vsel %vm255_vm1, %v254_v6, 0.0  ;;  %v264_v9 = vsel %vm255_vm1, %v263_v7, 0.0  ;;  %v273_v13 = vsel %vm255_vm1, %v272_v10, 0.0  ;;  %v281_v14 = vld [vmem:[%s219_s24 + $0xc] sm:$0xf] }
  0x12   : > { %249 = vmatpush.msra.mxu0 %v228_v5  ;;  %v257_v11 = vrot.slane %v256_v8, 4  ;;  %v265_v12 = vrot.slane %v264_v9, 4  ;;  %v274_v17 = vrot.slane %v273_v13, 4  ;;  %v282_v18 = vsel %vm255_vm1, %v281_v14, 0.0 }
  0x13   : > { %445 = vmatmul.msk.f32.vlgmr.msra.gmra.mxu0 %vm230_vm0, %v227_v3  ;;  %v283_v22 = vrot.slane %v282_v18, 4 }
  0x14   : > { %v258_v15 = vadd.f32 %v257_v11, %v256_v8  ;;  %v266_v16 = vadd.f32 %v265_v12, %v264_v9  ;;  %v275_v21 = vadd.f32 %v274_v17, %v273_v13 }
  0x15   : > { %v284_v26 = vadd.f32 %v283_v22, %v282_v18 }
  0x16   : > { %354 = vperm.xlu0 %474, %v351_v4   ;;  %v259_v19 = vrot.slane %v258_v15, 2  ;;  %v267_v20 = vrot.slane %v266_v16, 2  ;;  %v276_v25 = vrot.slane %v275_v21, 2 }
  0x17   : > { %v285_v30 = vrot.slane %v284_v26, 2 }
  0x18   : > { %v260_v23 = vadd.f32 %v259_v19, %v258_v15  ;;  %v268_v24 = vadd.f32 %v267_v20, %v266_v16  ;;  %v277_v29 = vadd.f32 %v276_v25, %v275_v21 }
  0x19   : > { %v286_v34 = vadd.f32 %v285_v30, %v284_v26 }
  0x1a   : > { %v261_v27 = vrot.slane %v260_v23, 1  ;;  %v269_v28 = vrot.slane %v268_v24, 1  ;;  %v278_v33 = vrot.slane %v277_v29, 1 }
  0x1b   : > { %v287_v37 = vrot.slane %v286_v34, 1 }
  0x1c   : > { %v262_v31 = vadd.f32 %v261_v27, %v260_v23  ;;  %v270_v32 = vadd.f32 %v269_v28, %v268_v24  ;;  %v279_v36 = vadd.f32 %v278_v33, %v277_v29 }
  0x1d   : > { %v288_v39 = vadd.f32 %v287_v37, %v286_v34 }
  0x1e   : > { %v271_v35 = vadd.f32 %v270_v32, %v262_v31 }
  0x20   : > { %v280_v38 = vadd.f32 %v279_v36, %v271_v35 }
  0x22   : > { %v289_v40 = vadd.f32 %v288_v39, %v280_v38 }
  0x24   : > { %v290_v41 = vmul.f32 0.0625, %v289_v40 }
  0x26   : > { %v291_v42 = vsub.f32 %v254_v6, %v290_v41  ;;  %v300_v43 = vsub.f32 %v263_v7, %v290_v41  ;;  %v310_v46 = vsub.f32 %v272_v10, %v290_v41  ;;  %v320_v50 = vsub.f32 %v281_v14, %v290_v41 }
  0x28   : > { %v292_v44 = vmul.f32 %v291_v42, %v291_v42  ;;  %v301_v45 = vmul.f32 %v300_v43, %v300_v43  ;;  %v311_v49 = vmul.f32 %v310_v46, %v310_v46  ;;  %v321_v54 = vmul.f32 %v320_v50, %v320_v50 }
  0x2a   : > { %v293_v47 = vsel %vm255_vm1, %v292_v44, 0.0  ;;  %v302_v48 = vsel %vm255_vm1, %v301_v45, 0.0  ;;  %v312_v53 = vsel %vm255_vm1, %v311_v49, 0.0  ;;  %v322_v58 = vsel %vm255_vm1, %v321_v54, 0.0 }
  0x2b   : > { %v294_v51 = vrot.slane %v293_v47, 4  ;;  %v303_v52 = vrot.slane %v302_v48, 4  ;;  %v313_v57 = vrot.slane %v312_v53, 4  ;;  %v323_v62 = vrot.slane %v322_v58, 4 }
  0x2d   : > { %v295_v55 = vadd.f32 %v294_v51, %v293_v47  ;;  %v304_v56 = vadd.f32 %v303_v52, %v302_v48  ;;  %v314_v61 = vadd.f32 %v313_v57, %v312_v53  ;;  %v324_v2 = vadd.f32 %v323_v62, %v322_v58 }
  0x2f   : > { %v296_v59 = vrot.slane %v295_v55, 2  ;;  %v305_v60 = vrot.slane %v304_v56, 2  ;;  %v315_v1 = vrot.slane %v314_v61, 2  ;;  %v325_v6 = vrot.slane %v324_v2, 2 }
  0x31   : > { %v297_v63 = vadd.f32 %v296_v59, %v295_v55  ;;  %v306_v0 = vadd.f32 %v305_v60, %v304_v56  ;;  %v316_v5 = vadd.f32 %v315_v1, %v314_v61  ;;  %v326_v10 = vadd.f32 %v325_v6, %v324_v2 }
  0x33   : > { %v298_v3 = vrot.slane %v297_v63, 1  ;;  %v307_v4 = vrot.slane %v306_v0, 1  ;;  %v317_v9 = vrot.slane %v316_v5, 1  ;;  %v327_v13 = vrot.slane %v326_v10, 1 }
  0x35   : > { %v299_v7 = vadd.f32 %v298_v3, %v297_v63  ;;  %v308_v8 = vadd.f32 %v307_v4, %v306_v0  ;;  %v318_v12 = vadd.f32 %v317_v9, %v316_v5  ;;  %v328_v15 = vadd.f32 %v327_v13, %v326_v10 }
  0x37   : > { %v309_v11 = vadd.f32 %v308_v8, %v299_v7 }
  0x39   : > { %v319_v14 = vadd.f32 %v318_v12, %v309_v11 }
  0x3b   : > { %v329_v16 = vadd.f32 %v328_v15, %v319_v14 }
  0x3d   : > { %v330_v17 = vmul.f32 0.0625, %v329_v16 }
  0x3f   : > { %v331_v18 = vadd.f32 1e-05, %v330_v17 }
  0x41   : > { %475 = vrsqrt.f32 %v331_v18  ;;  %vm338_vm2 = vweird.f32 %v331_v18 }
  0x47   : > { %v476_v19 = vpop.eup %475 }
  0x48   : > { %v333_v20 = vmul.f32 %v476_v19, %v331_v18  ;;  %vm339_vm3 = vweird.f32 %v476_v19 }
  0x49   : > { %vm340_vm4 = vmor %vm338_vm2, %vm339_vm3 }
  0x4a   : > { %v334_v21 = vmul.f32 %v476_v19, %v333_v20 }
  0x4c   : > { %v335_v22 = vmul.f32 0.5, %v334_v21 }
  0x4e   : > { %v336_v23 = vsub.f32 1.5, %v335_v22 }
  0x50   : > { %v337_v25 = vmul.f32 %v476_v19, %v336_v23 }
  0x52   : > { %v341_v28 = vsel %vm340_vm4, %v476_v19, %v337_v25 }
  0x80   : > { %v346_v24 = vpop.permute.xlu0 %345 }
  0x81   : > { %v348_v26 = vmul.f32 %v346_v24, %v290_v41 }
  0x88   : > { %v355_v31 = vpop.permute.xlu0 %354 }
  0x90   : > { %v251_v27 = vpop.f32.mrf.mxu0 }
  0x91   : > { %v349_v29 = vsub.f32 %v251_v27, %v348_v26 }
  0x93   : > { %v350_v30 = vmul.f32 %v349_v29, %v341_v28 }
  0x95   : > { %v357_v32 = vadd.f32 %v355_v31, %v350_v30 }
  0x97   : > { %359 = vst.msk [vmem:[%s226_s6] sm:$0xff] %vm358_vm5, %v357_v32 }
  0x98 PF: > { %s14_s17 = sadd.s32 1, %s499_s17   ;;  %s586_s15 = smov %s495_s16 }
  0x99   : > { %p11_p5 = scmp.ge.s32.totalorder %s14_s17, 4   ;;  %s587_s16 = smov %s589_s18 }
  0x9b   :  { %13 = sbr.rel (!%p11_p5) target bundleno = 2 (0x2), region = 66 }

</bundles_post_ra>
